<compile_context>
chip_gen: v6e
topology: v6e:2x2x1
jax: 0.10.0
libtpu: 0.0.40
codegen_flags: <defaults>
</compile_context>

<pallas_src>
import functools

import jax
import jax.numpy as jnp
from jax.experimental import pallas as pl
from jax.experimental.pallas import tpu as pltpu


def _cat(parts, axis):
    return parts[0] if len(parts) == 1 else jnp.concatenate(parts, axis=axis)


def _spatio_conv_kernel(x_ref, th_ref, gk_ref, bias_ref, o_ref, *,
                        n_slabs, c_out, b_tile):
    # x_ref:    (b_tile*c_in, TN)               one batch tile, channels-first
    # th_ref:   (b_tile*n_slabs*c_out, b_tile*c_in)   kron(I_btile, theta_aug)
    # gk_ref:   (n_slabs*TN, TN)                stacked kron(I_T, GK_s); last = I
    # bias_ref: (b_tile*c_out, 1)               gconv bias + residual bias
    # o_ref:    (b_tile*c_out, TN)
    X = x_ref[...]                                                  # fp32

    # (1) channel mixing: all batches, all Ks slabs and the residual projection
    #     in ONE MXU matmul.  Z rows are ordered (b, s, co).
    Z = jnp.dot(th_ref[...], X, preferred_element_type=jnp.float32)

    # (2) relayout (b, s, co, tn) -> (b*c_out + co, s*TN + tn): static sublane
    #     slices at multiples of 8 + lane concats at multiples of 128 -> pure
    #     vreg moves (few vregs total), no XLU-heavy transpose.
    per_batch = []
    for b in range(b_tile):
        slabs = [Z[(b * n_slabs + s) * c_out:(b * n_slabs + s + 1) * c_out, :]
                 for s in range(n_slabs)]
        per_batch.append(_cat(slabs, axis=1))          # (c_out, n_slabs*TN)
    z_cat = _cat(per_batch, axis=0)                    # (b_tile*c_out, n_slabs*TN)

    # (3) node mixing: single fused K = (Ks+1)*TN contraction.
    acc = jnp.dot(z_cat, gk_ref[...], preferred_element_type=jnp.float32)

    o_ref[...] = jnp.maximum(acc + bias_ref[...], 0.0).astype(o_ref.dtype)


def prepare_params(graph_kernel, theta, bias, conv_w, conv_b, *,
                   Ks, c_in, c_out, T, N, b_tile):
    """One-time parameter preprocessing (hoisted out of the forward path).

    Returns:
      th_kron : (b_tile*(Ks+1)*c_out, b_tile*c_in)  kron(I_btile, [theta slabs; W_res])
      g_cat   : ((Ks+1)*T*N, T*N)                   stacked kron(I_T, GK_s); last = I
      bias_col: (b_tile*c_out, 1)                   gconv bias + residual bias
    """
    f32 = jnp.float32
    TN = T * N

    # theta rows are indexed r = ci*Ks + ks  ->  theta_r[ks, ci, co]
    theta_r = jnp.transpose(theta.reshape(c_in, Ks, c_out), (1, 0, 2)).astype(f32)
    # stacked as (Ks*c_out, c_in): row ks*c_out + co  <-  theta_r[ks, :, co]
    theta_stack = jnp.transpose(theta_r, (0, 2, 1)).reshape(Ks * c_out, c_in)

    # residual projection as a (c_out, c_in) matrix (+ bias)
    if c_in > c_out:                         # 1x1 conv bottleneck
        wres = conv_w[:, :, 0, 0].astype(f32)
        bres = conv_b.astype(f32)
    else:                                    # identity / zero-padded identity
        wres = jnp.eye(c_out, c_in, dtype=f32)
        bres = jnp.zeros((c_out,), f32)

    theta_aug = jnp.concatenate([theta_stack, wres], axis=0)   # ((Ks+1)*c_out, c_in)
    th_kron = jnp.einsum("bB,rc->brBc", jnp.eye(b_tile, dtype=f32),
                         theta_aug).reshape(b_tile * (Ks + 1) * c_out,
                                            b_tile * c_in)

    # graph kernel: column j = ks*N + n  ->  GK[ks][m, n]
    gk3 = jnp.transpose(graph_kernel.reshape(N, Ks, N), (1, 0, 2)).astype(f32)
    # block-diagonal over time:  kron(I_T, GK_s); appended identity = residual slab
    bd = jnp.einsum("tu,kmn->ktmun", jnp.eye(T, dtype=f32), gk3).reshape(Ks, TN, TN)
    g_cat = jnp.concatenate([bd, jnp.eye(TN, dtype=f32)[None]], axis=0)
    g_cat = g_cat.reshape((Ks + 1) * TN, TN)

    bias_col = jnp.tile((bias.astype(f32) + bres).reshape(c_out, 1), (b_tile, 1))
    return th_kron, g_cat, bias_col


@functools.partial(jax.jit, static_argnames=("c_in", "c_out", "b_tile"))
def spatio_conv_layer(x, th_kron, g_cat, bias_col, *, c_in, c_out, b_tile):
    """x: (B, C_in, T, N) float32 -> (B, c_out, T, N) float32 (PyTorch layout)."""
    B, C_in, T, N = x.shape
    assert C_in == c_in
    TN = T * N
    n_slabs = g_cat.shape[0] // TN
    f32 = jnp.float32

    nb = -(-B // b_tile)            # ceil(B / b_tile)
    B_pad = nb * b_tile

    # ---- activations: free row-major reshapes only (no HBM transposes) ------
    x2 = x.astype(f32).reshape(B, c_in, TN)
    if B_pad != B:
        x2 = jnp.concatenate([x2, jnp.zeros((B_pad - B, c_in, TN), f32)], axis=0)
    x3 = x2.reshape(nb, b_tile * c_in, TN)

    kernel = functools.partial(_spatio_conv_kernel,
                               n_slabs=n_slabs, c_out=c_out, b_tile=b_tile)

    out3 = pl.pallas_call(
        kernel,
        out_shape=jax.ShapeDtypeStruct((nb, b_tile * c_out, TN), f32),
        grid=(nb,),
        in_specs=[
            pl.BlockSpec((None, b_tile * c_in, TN), lambda i: (i, 0, 0)),
            pl.BlockSpec(th_kron.shape, lambda i: (0, 0)),
            pl.BlockSpec(g_cat.shape, lambda i: (0, 0)),
            pl.BlockSpec(bias_col.shape, lambda i: (0, 0)),
        ],
        out_specs=pl.BlockSpec((None, b_tile * c_out, TN), lambda i: (i, 0, 0)),
        compiler_params=pltpu.CompilerParams(
            dimension_semantics=("parallel",)),
    )(x3, th_kron, g_cat, bias_col)

    return out3.reshape(B_pad, c_out, TN)[:B].reshape(B, c_out, T, N)


# ---- pure-JAX reference that mirrors the PyTorch forward verbatim -----------
def reference(x, graph_kernel, theta, bias, conv_w, conv_b, Ks, c_in, c_out):
    B, C_in, T, N = x.shape
    if C_in > c_out:
        x_input = (jnp.einsum("oc,bctn->botn", conv_w[:, :, 0, 0], x)
                   + conv_b[None, :, None, None])
    elif C_in < c_out:
        zeros = jnp.zeros((B, c_out - C_in, T, N), x.dtype)
        x_input = jnp.concatenate((x, zeros), axis=1)
    else:
        x_input = x
    outs = []
    for t in range(T):
        x_t = jnp.transpose(x[:, :, t, :], (0, 2, 1))                 # (B,N,Cin)
        x_tmp = jnp.transpose(x_t, (0, 2, 1)).reshape(B * c_in, N)
        x_mul = (x_tmp @ graph_kernel).reshape(B, c_in, Ks, N)
        x_ker = jnp.transpose(x_mul, (0, 3, 1, 2)).reshape(B * N, c_in * Ks)
        out_t = (x_ker @ theta + bias).reshape(B, N, c_out)
        outs.append(jnp.transpose(out_t, (0, 2, 1)))
    x_gc = jnp.stack(outs, axis=2)
    return jax.nn.relu(x_gc + x_input)


if __name__ == "__main__":
    # small deterministic setup
    B, c_in, c_out, T, N, Ks = 2, 4, 8, 8, 16, 3
    b_tile = min(B, 8)

    key = jax.random.PRNGKey(0)
    k_x, k_gk, k_th, k_cw, k_cb = jax.random.split(key, 5)

    x = jax.random.normal(k_x, (B, c_in, T, N), jnp.float32)
    graph_kernel = jax.random.normal(k_gk, (N, Ks * N), jnp.float32) * 0.3

    # xavier_uniform_ for theta (Ks*c_in, c_out)
    fan_in, fan_out = Ks * c_in, c_out
    bound = (6.0 / (fan_in + fan_out)) ** 0.5
    theta = jax.random.uniform(k_th, (Ks * c_in, c_out), jnp.float32, -bound, bound)
    bias = jnp.zeros((c_out,), jnp.float32)

    # bottleneck 1x1 conv params (only used when c_in > c_out, kept for generality)
    conv_w = jax.random.normal(k_cw, (c_out, c_in, 1, 1), jnp.float32) * 0.1
    conv_b = jax.random.normal(k_cb, (c_out,), jnp.float32) * 0.1

    # one-time parameter preprocessing (hoisted out of the forward path)
    th_kron, g_cat, bias_col = prepare_params(
        graph_kernel, theta, bias, conv_w, conv_b,
        Ks=Ks, c_in=c_in, c_out=c_out, T=T, N=N, b_tile=b_tile)

    out = spatio_conv_layer(x, th_kron, g_cat, bias_col,
                            c_in=c_in, c_out=c_out, b_tile=b_tile)
    out = jax.block_until_ready(out)

    ref = reference(x, graph_kernel, theta, bias, conv_w, conv_b, Ks, c_in, c_out)
    assert out.shape == (B, c_out, T, N)
    assert jnp.allclose(out, ref, atol=1e-4, rtol=1e-4)

    print("KERNEL_OK")
</pallas_src>

<mosaic_0001>
module attributes {stable_mosaic.version = 11 : i64} {
  func.func @_spatio_conv_kernel(%arg0: i32, %arg1: memref<1x8x128xf32, #tpu.memory_space<vmem>>, %arg2: memref<64x8xf32, #tpu.memory_space<vmem>>, %arg3: memref<512x128xf32, #tpu.memory_space<vmem>>, %arg4: memref<16x1xf32, #tpu.memory_space<vmem>>, %arg5: memref<1x16x128xf32, #tpu.memory_space<vmem>>) attributes {dimension_semantics = [#tpu.dimension_semantics<parallel>], iteration_bounds = array<i64: 1>, scalar_prefetch = 0 : i64, scratch_operands = 0 : i64, tpu.core_type = #tpu.core_type<tc>, window_params = [{transform_indices = @transform_0, window_bounds = array<i64: 1, 8, 128>}, {pipeline_mode = #tpu.pipeline_mode<synchronous>, transform_indices = @transform_1, window_bounds = array<i64: 64, 8>}, {pipeline_mode = #tpu.pipeline_mode<synchronous>, transform_indices = @transform_2, window_bounds = array<i64: 512, 128>}, {pipeline_mode = #tpu.pipeline_mode<synchronous>, transform_indices = @transform_3, window_bounds = array<i64: 16, 1>}, {transform_indices = @transform_4, window_bounds = array<i64: 1, 16, 128>}]} {
    %c0 = arith.constant 0 : index
    %c0_0 = arith.constant 0 : index
    %c0_1 = arith.constant 0 : index
    %0 = vector.load %arg1[%c0, %c0_0, %c0_1] : memref<1x8x128xf32, #tpu.memory_space<vmem>>, vector<1x8x128xf32>
    %1 = vector.shape_cast %0 : vector<1x8x128xf32> to vector<8x128xf32>
    %c0_2 = arith.constant 0 : index
    %c0_3 = arith.constant 0 : index
    %2 = vector.load %arg2[%c0_2, %c0_3] : memref<64x8xf32, #tpu.memory_space<vmem>>, vector<64x8xf32>
    %cst = arith.constant dense<0.000000e+00> : vector<64x128xf32>
    %3 = tpu.matmul %2, %1, %cst {dimension_numbers = #tpu.dot_dimension_numbers<[1], [0], [0], [1], [0, 0, 1, 1], [], []>} : vector<64x8xf32>, vector<8x128xf32>, vector<64x128xf32> -> vector<64x128xf32>
    %4 = vector.extract_strided_slice %3 {offsets = [0, 0], sizes = [8, 128], strides = [1, 1]} : vector<64x128xf32> to vector<8x128xf32>
    %5 = vector.extract_strided_slice %3 {offsets = [8, 0], sizes = [8, 128], strides = [1, 1]} : vector<64x128xf32> to vector<8x128xf32>
    %6 = vector.extract_strided_slice %3 {offsets = [16, 0], sizes = [8, 128], strides = [1, 1]} : vector<64x128xf32> to vector<8x128xf32>
    %7 = vector.extract_strided_slice %3 {offsets = [24, 0], sizes = [8, 128], strides = [1, 1]} : vector<64x128xf32> to vector<8x128xf32>
    %8 = tpu.concatenate %4, %5, %6, %7 in 1 : vector<8x128xf32>, vector<8x128xf32>, vector<8x128xf32>, vector<8x128xf32> -> vector<8x512xf32>
    %9 = vector.extract_strided_slice %3 {offsets = [32, 0], sizes = [8, 128], strides = [1, 1]} : vector<64x128xf32> to vector<8x128xf32>
    %10 = vector.extract_strided_slice %3 {offsets = [40, 0], sizes = [8, 128], strides = [1, 1]} : vector<64x128xf32> to vector<8x128xf32>
    %11 = vector.extract_strided_slice %3 {offsets = [48, 0], sizes = [8, 128], strides = [1, 1]} : vector<64x128xf32> to vector<8x128xf32>
    %12 = vector.extract_strided_slice %3 {offsets = [56, 0], sizes = [8, 128], strides = [1, 1]} : vector<64x128xf32> to vector<8x128xf32>
    %13 = tpu.concatenate %9, %10, %11, %12 in 1 : vector<8x128xf32>, vector<8x128xf32>, vector<8x128xf32>, vector<8x128xf32> -> vector<8x512xf32>
    %14 = tpu.concatenate %8, %13 in 0 : vector<8x512xf32>, vector<8x512xf32> -> vector<16x512xf32>
    %c0_4 = arith.constant 0 : index
    %c0_5 = arith.constant 0 : index
    %15 = vector.load %arg3[%c0_4, %c0_5] : memref<512x128xf32, #tpu.memory_space<vmem>>, vector<512x128xf32>
    %cst_6 = arith.constant dense<0.000000e+00> : vector<16x128xf32>
    %16 = tpu.matmul %14, %15, %cst_6 {dimension_numbers = #tpu.dot_dimension_numbers<[1], [0], [0], [1], [0, 0, 1, 1], [], []>} : vector<16x512xf32>, vector<512x128xf32>, vector<16x128xf32> -> vector<16x128xf32>
    %c0_7 = arith.constant 0 : index
    %c0_8 = arith.constant 0 : index
    %17 = vector.load %arg4[%c0_7, %c0_8] : memref<16x1xf32, #tpu.memory_space<vmem>>, vector<16x1xf32>
    %18 = vector.broadcast %17 : vector<16x1xf32> to vector<16x128xf32>
    %19 = arith.addf %16, %18 : vector<16x128xf32>
    %cst_9 = arith.constant 0.000000e+00 : f32
    %20 = vector.broadcast %cst_9 : f32 to vector<16x128xf32>
    %21 = arith.maximumf %19, %20 : vector<16x128xf32>
    %c0_10 = arith.constant 0 : index
    %c0_11 = arith.constant 0 : index
    %c0_12 = arith.constant 0 : index
    %22 = vector.load %arg5[%c0_10, %c0_11, %c0_12] : memref<1x16x128xf32, #tpu.memory_space<vmem>>, vector<1x16x128xf32>
    %23 = vector.shape_cast %22 : vector<1x16x128xf32> to vector<16x128xf32>
    %24 = vector.shape_cast %21 : vector<16x128xf32> to vector<1x16x128xf32>
    tpu.vector_store %arg5[%c0_10, %c0_11, %c0_12], %24 {strides = array<i32>} : memref<1x16x128xf32, #tpu.memory_space<vmem>>, vector<1x16x128xf32>,
    return
  }
  func.func @transform_0(%arg0: i32) -> (i32, i32, i32) {
    %c0_i32 = arith.constant 0 : i32
    %c0_i32_0 = arith.constant 0 : i32
    %c0_i32_1 = arith.constant 0 : i32
    return %arg0, %c0_i32, %c0_i32_0 : i32, i32, i32
  }
  func.func @transform_1(%arg0: i32) -> (i32, i32) {
    %c0_i32 = arith.constant 0 : i32
    %c0_i32_0 = arith.constant 0 : i32
    %c0_i32_1 = arith.constant 0 : i32
    return %c0_i32, %c0_i32_0 : i32, i32
  }
  func.func @transform_2(%arg0: i32) -> (i32, i32) {
    %c0_i32 = arith.constant 0 : i32
    %c0_i32_0 = arith.constant 0 : i32
    %c0_i32_1 = arith.constant 0 : i32
    return %c0_i32, %c0_i32_0 : i32, i32
  }
  func.func @transform_3(%arg0: i32) -> (i32, i32) {
    %c0_i32 = arith.constant 0 : i32
    %c0_i32_0 = arith.constant 0 : i32
    %c0_i32_1 = arith.constant 0 : i32
    return %c0_i32, %c0_i32_0 : i32, i32
  }
  func.func @transform_4(%arg0: i32) -> (i32, i32, i32) {
    %c0_i32 = arith.constant 0 : i32
    %c0_i32_0 = arith.constant 0 : i32
    %c0_i32_1 = arith.constant 0 : i32
    return %arg0, %c0_i32, %c0_i32_0 : i32, i32, i32
  }
}

</mosaic_0001>

<bundles_post_ra>
// kernel: spatio_conv_layer.1
= control target key start
LH: loop header
LB: loop body
LE: loop exit
PB: predicated region body
PF: predicated region fallthrough
CT: control target
= control target key end

     0   :  { %9 = vsyncpa [#allocation3], 0  ;;  %s539_s15 = smov [#allocation2]   ;;  %s618_s0 = inlined_call_operand.vmem [shape: f32[1,8,128], index: 0, kind: input, shape index: {}]   ;;  %s619_s1 = inlined_call_operand.vmem [shape: f32[64,8], index: 1, kind: input, shape index: {}]   ;;  %s620_s2 = inlined_call_operand.hbm [shape: f32[512,128], index: 2, kind: input, shape index: {}]   ;;  %s621_s3 = inlined_call_operand.vmem [shape: f32[16,1], index: 3, kind: input, shape index: {}]   ;;  %s622_s4 = inlined_call_operand.vmem [shape: f32[1,16,128], index: 4, kind: output, shape index: {}]  }
   0x1   :  { %s19_s16 = sshll.u32 %s539_s15, 4  ;;  %s20_s16 = int_to_ptr.vmem [resolvable:$true] %s19_s16 }
   0x2   :  { %s525_s17 = scalar_lea.vmem %s20_s16, 8192  ;;  %p530_p1 = scmp.lt.s32.totalorder %s20_s16, %s20_s16 }
   0x3   :  { %p526_p0 = scmp.ne.s32.totalorder %s20_s16, %s525_s17  ;;  %p531_p2 = scmp.lt.s32.totalorder %s525_s17, %s525_s17 }
   0x5   :  { %p532_p3 = por %p531_p2, %p530_p1 }
   0x7   :  { %p533_p4 = pnand %p532_p3, %p526_p0 }
   0x9   :  { %536 = shalt.err (!%p533_p4)
}
   0xa   :  { %s540_s18 = smov 128   ;;  %s541_s19 = smov 8  }
   0xb   :  { %25 = dma.hbm_to_vmem [thread:$0]  %s620_s2, 8192, %s20_s16, [#allocation3], %s540_s18, %s540_s18, %s541_s19  }
   0xc   :  { %537 = dma.done.wait [#allocation3], 8192  }
   0xd   :  { %538 = vsyncadd [#allocation3], 4294959104  ;;  %vm40_vm0 = vcmask 64512   ;;  %v31_v0 = vld [vmem:[%s618_s0] sm:$0xff]  ;;  %v33_v2 = vld [vmem:[%s619_s1 + $0x8] sm:$0xff] }
   0xe   :  { %v32_v1 = vld [vmem:[%s619_s1] sm:$0xff]  ;;  %498 = vmatprep.subr.mxu0 %v31_v0  ;;  %v34_v3 = vld [vmem:[%s619_s1 + $0x10] sm:$0xff]  ;;  %v201_v4 = vld [vmem:[#allocation2 + $0xf8] sm:$0xff] }
   0xf   :  { %500 = vmatprep.mubr.msk.f32.mxu0 %vm40_vm0, %v32_v1  ;;  %499 = vmatpush3.msra.mxu0 %v31_v0  ;;  %v185_v5 = vld [vmem:[#allocation2 + $0x78] sm:$0xff]  ;;  %v200_v6 = vld [vmem:[#allocation2 + $0xf0] sm:$0xff]  ;;  %v36_v10 = vld [vmem:[%s619_s1 + $0x20] sm:$0xff] }
  0x10   :  { %501 = vmatmul.mubr.msk.f32.vlgmr.msra.gmra.mxu0 %vm40_vm0, %v33_v2  ;;  %v35_v7 = vld [vmem:[%s619_s1 + $0x18] sm:$0xff]  ;;  %422 = vmatprep.subr.mxu1 %v201_v4  ;;  %v184_v8 = vld [vmem:[#allocation2 + $0x70] sm:$0xff]  ;;  %v199_v11 = vld [vmem:[#allocation2 + $0xe8] sm:$0xff] }
  0x11   :  { %503 = vmatprep.mubr.msk.f32.mxu0 %vm40_vm0, %v34_v3  ;;  %v233_v9 = vld [vmem:[#allocation2 + $0x1f8] sm:$0xff]  ;;  %423 = vmatpush3.msra.mxu1 %v185_v5  ;;  %v183_v13 = vld [vmem:[#allocation2 + $0x68] sm:$0xff]  ;;  %v232_v14 = vld [vmem:[#allocation2 + $0x1f0] sm:$0xff] }
  0x12   :  { %460 = vmatprep.subr.mxu0 %v233_v9  ;;  %v217_v12 = vld [vmem:[#allocation2 + $0x178] sm:$0xff]  ;;  %424 = vmatprep.subr.mxu1 %v200_v6  ;;  %v198_v15 = vld [vmem:[#allocation2 + $0xe0] sm:$0xff]  ;;  %v216_v16 = vld [vmem:[#allocation2 + $0x170] sm:$0xff] }
  0x13   :  { %461 = vmatpush3.msra.mxu0 %v217_v12  ;;  %425 = vmatpush3.msra.mxu1 %v184_v8  ;;  %v37_v17 = vld [vmem:[%s619_s1 + $0x28] sm:$0xff]  ;;  %v182_v18 = vld [vmem:[#allocation2 + $0x60] sm:$0xff]  ;;  %v38_v19 = vld [vmem:[%s619_s1 + $0x30] sm:$0xff] }
  0x14   :  { %504 = vmatmul.mubr.msk.f32.gmra.mxu0 %vm40_vm0, %v35_v7  ;;  %426 = vmatprep.subr.mxu1 %v199_v11  ;;  %v197_v20 = vld [vmem:[#allocation2 + $0xd8] sm:$0xff]  ;;  %v231_v21 = vld [vmem:[#allocation2 + $0x1e8] sm:$0xff]  ;;  %v196_v24 = vld [vmem:[#allocation2 + $0xd0] sm:$0xff] }
  0x15   :  { %506 = vmatprep.mubr.msk.f32.mxu0 %vm40_vm0, %v36_v10  ;;  %427 = vmatpush3.msra.mxu1 %v183_v13  ;;  %v181_v22 = vld [vmem:[#allocation2 + $0x58] sm:$0xff]  ;;  %v215_v23 = vld [vmem:[#allocation2 + $0x168] sm:$0xff]  ;;  %v230_v26 = vld [vmem:[#allocation2 + $0x1e0] sm:$0xff]  ;;  %v542_v10 = vmov 0  }
  0x16   :  { %462 = vmatprep.subr.mxu0 %v232_v14  ;;  %428 = vmatprep.subr.mxu1 %v198_v15  ;;  %v39_v25 = vld [vmem:[%s619_s1 + $0x38] sm:$0xff]  ;;  %v180_v27 = vld [vmem:[#allocation2 + $0x50] sm:$0xff]  ;;  %v214_v28 = vld [vmem:[#allocation2 + $0x160] sm:$0xff] }
  0x17   :  { %463 = vmatpush3.msra.mxu0 %v216_v16  ;;  %429 = vmatpush3.msra.mxu1 %v182_v18  ;;  %v195_v29 = vld [vmem:[#allocation2 + $0xc8] sm:$0xff]  ;;  %v229_v30 = vld [vmem:[#allocation2 + $0x1d8] sm:$0xff]  ;;  %v194_v33 = vld [vmem:[#allocation2 + $0xc0] sm:$0xff] }
  0x18   :  { %507 = vmatmul.mubr.msk.f32.gmra.mxu0 %vm40_vm0, %v37_v17  ;;  %430 = vmatprep.subr.mxu1 %v197_v20  ;;  %v179_v31 = vld [vmem:[#allocation2 + $0x48] sm:$0xff]  ;;  %v213_v32 = vld [vmem:[#allocation2 + $0x158] sm:$0xff]  ;;  %v228_v34 = vld [vmem:[#allocation2 + $0x1d0] sm:$0xff] }
  0x19   :  { %509 = vmatprep.mubr.msk.f32.mxu0 %vm40_vm0, %v38_v19  ;;  %464 = vmatprep.subr.mxu0 %v231_v21  ;;  %v178_v35 = vld [vmem:[#allocation2 + $0x40] sm:$0xff]  ;;  %v212_v36 = vld [vmem:[#allocation2 + $0x150] sm:$0xff]  ;;  %v193_v37 = vld [vmem:[#allocation2 + $0xb8] sm:$0xff] }
  0x1a   :  { %431 = vmatpush3.msra.mxu1 %v181_v22  ;;  %465 = vmatpush3.msra.mxu0 %v215_v23  ;;  %v227_v38 = vld [vmem:[#allocation2 + $0x1c8] sm:$0xff]  ;;  %v177_v39 = vld [vmem:[#allocation2 + $0x38] sm:$0xff]  ;;  %v192_v41 = vld [vmem:[#allocation2 + $0xb0] sm:$0xff] }
  0x1b   :  { %432 = vmatprep.subr.mxu1 %v196_v24  ;;  %466 = vmatprep.subr.mxu0 %v230_v26  ;;  %v211_v40 = vld [vmem:[#allocation2 + $0x148] sm:$0xff]  ;;  %v226_v42 = vld [vmem:[#allocation2 + $0x1c0] sm:$0xff]  ;;  %v176_v43 = vld [vmem:[#allocation2 + $0x30] sm:$0xff] }
  0x1c   :  { %510 = vmatmul.mubr.msk.f32.gmra.mxu0 %vm40_vm0, %v39_v25  ;;  %433 = vmatpush3.msra.mxu1 %v180_v27  ;;  %v210_v44 = vld [vmem:[#allocation2 + $0x140] sm:$0xff]  ;;  %v191_v45 = vld [vmem:[#allocation2 + $0xa8] sm:$0xff]  ;;  %v225_v46 = vld [vmem:[#allocation2 + $0x1b8] sm:$0xff] }
  0x1d   :  { %467 = vmatpush3.msra.mxu0 %v214_v28  ;;  %434 = vmatprep.subr.mxu1 %v195_v29  ;;  %v175_v47 = vld [vmem:[#allocation2 + $0x28] sm:$0xff]  ;;  %v209_v48 = vld [vmem:[#allocation2 + $0x138] sm:$0xff]  ;;  %v190_v49 = vld [vmem:[#allocation2 + $0xa0] sm:$0xff] }
  0x1e   :  { %468 = vmatprep.subr.mxu0 %v229_v30  ;;  %435 = vmatpush3.msra.mxu1 %v179_v31  ;;  %v224_v50 = vld [vmem:[#allocation2 + $0x1b0] sm:$0xff]  ;;  %v174_v51 = vld [vmem:[#allocation2 + $0x20] sm:$0xff]  ;;  %v189_v53 = vld [vmem:[#allocation2 + $0x98] sm:$0xff] }
  0x1f   :  { %469 = vmatpush3.msra.mxu0 %v213_v32  ;;  %436 = vmatprep.subr.mxu1 %v194_v33  ;;  %v208_v52 = vld [vmem:[#allocation2 + $0x130] sm:$0xff]  ;;  %v223_v54 = vld [vmem:[#allocation2 + $0x1a8] sm:$0xff]  ;;  %v173_v55 = vld [vmem:[#allocation2 + $0x18] sm:$0xff] }
  0x20   :  { %470 = vmatprep.subr.mxu0 %v228_v34  ;;  %437 = vmatpush3.msra.mxu1 %v178_v35  ;;  %v207_v56 = vld [vmem:[#allocation2 + $0x128] sm:$0xff]  ;;  %v188_v57 = vld [vmem:[#allocation2 + $0x90] sm:$0xff]  ;;  %v222_v58 = vld [vmem:[#allocation2 + $0x1a0] sm:$0xff] }
  0x21   :  { %471 = vmatpush3.msra.mxu0 %v212_v36  ;;  %438 = vmatprep.subr.mxu1 %v193_v37  ;;  %v172_v59 = vld [vmem:[#allocation2 + $0x10] sm:$0xff]  ;;  %v206_v60 = vld [vmem:[#allocation2 + $0x120] sm:$0xff]  ;;  %v187_v61 = vld [vmem:[#allocation2 + $0x88] sm:$0xff] }
  0x22   :  { %472 = vmatprep.subr.mxu0 %v227_v38  ;;  %439 = vmatpush3.msra.mxu1 %v177_v39  ;;  %v221_v62 = vld [vmem:[#allocation2 + $0x198] sm:$0xff]  ;;  %v171_v63 = vld [vmem:[#allocation2 + $0x8] sm:$0xff]  ;;  %v186_v1 = vld [vmem:[#allocation2 + $0x80] sm:$0xff] }
  0x23   :  { %473 = vmatpush3.msra.mxu0 %v211_v40  ;;  %440 = vmatprep.subr.mxu1 %v192_v41  ;;  %v205_v0 = vld [vmem:[#allocation2 + $0x118] sm:$0xff]  ;;  %v220_v2 = vld [vmem:[#allocation2 + $0x190] sm:$0xff]  ;;  %v170_v3 = vld [vmem:[#allocation2] sm:$0xff] }
  0x24   :  { %474 = vmatprep.subr.mxu0 %v226_v42  ;;  %441 = vmatpush3.msra.mxu1 %v176_v43  ;;  %v204_v4 = vld [vmem:[#allocation2 + $0x110] sm:$0xff]  ;;  %v219_v5 = vld [vmem:[#allocation2 + $0x188] sm:$0xff]  ;;  %v218_v7 = vld [vmem:[#allocation2 + $0x180] sm:$0xff] }
  0x25   :  { %475 = vmatpush3.msra.mxu0 %v210_v44  ;;  %442 = vmatprep.subr.mxu1 %v191_v45  ;;  %v203_v6 = vld [vmem:[#allocation2 + $0x108] sm:$0xff]  ;;  %v202_v8 = vld [vmem:[#allocation2 + $0x100] sm:$0xff] }
  0x26   :  { %476 = vmatprep.subr.mxu0 %v225_v46  ;;  %443 = vmatpush3.msra.mxu1 %v175_v47  ;;  %v234_v9 = vld [vmem:[%s621_s3] sm:$0xff]  ;;  %v235_v11 = vld [vmem:[%s621_s3 + $0x8] sm:$0xff] }
  0x27   :  { %477 = vmatpush3.msra.mxu0 %v209_v48  ;;  %444 = vmatprep.subr.mxu1 %v190_v49 }
  0x28   :  { %478 = vmatprep.subr.mxu0 %v224_v50  ;;  %445 = vmatpush3.msra.mxu1 %v174_v51 }
  0x29   :  { %479 = vmatpush3.msra.mxu0 %v208_v52  ;;  %446 = vmatprep.subr.mxu1 %v189_v53 }
  0x2a   :  { %480 = vmatprep.subr.mxu0 %v223_v54  ;;  %447 = vmatpush3.msra.mxu1 %v173_v55 }
  0x2b   :  { %481 = vmatpush3.msra.mxu0 %v207_v56  ;;  %448 = vmatprep.subr.mxu1 %v188_v57 }
  0x2c   :  { %482 = vmatprep.subr.mxu0 %v222_v58  ;;  %449 = vmatpush3.msra.mxu1 %v172_v59 }
  0x2d   :  { %483 = vmatpush3.msra.mxu0 %v206_v60  ;;  %450 = vmatprep.subr.mxu1 %v187_v61 }
  0x2e   :  { %484 = vmatprep.subr.mxu0 %v221_v62  ;;  %451 = vmatpush3.msra.mxu1 %v171_v63 }
  0x2f   :  { %485 = vmatpush3.msra.mxu0 %v205_v0  ;;  %452 = vmatprep.subr.mxu1 %v186_v1 }
  0x30   :  { %486 = vmatprep.subr.mxu0 %v220_v2  ;;  %453 = vmatpush3.msra.mxu1 %v170_v3 }
  0x31   :  { %487 = vmatpush3.msra.mxu0 %v204_v4  ;;  %516 = vset.pattern.permute.xlu0 %v542_v10 }
  0x32   :  { %488 = vmatprep.subr.mxu0 %v219_v5  ;;  %238 = vperm.xlu0 %516, %v234_v9  }
  0x33   :  { %489 = vmatpush3.msra.mxu0 %v203_v6 }
  0x34   :  { %490 = vmatprep.subr.mxu0 %v218_v7 }
  0x35   :  { %491 = vmatpush3.msra.mxu0 %v202_v8 }
  0x36   :  { %243 = vperm.xlu0 %516, %v235_v11  }
  0xad   :  { %v239_v23 = vpop.permute.xlu0 %238 }
  0xb1   :  { %v244_v34 = vpop.permute.xlu0 %243 }
  0xd0   :  { %v502_v12 = vpop.f32.mrf.mxu0 }
  0xd1   :  { %310 = vmatprep.mubr.f32.mxu1 %v502_v12 }
  0xd2   :  { %v131_v13 = vpop.f32.mrf.mxu0 }
  0xd3   :  { %311 = vmatmul.mubr.f32.vlgmr.msra.gmra.mxu1 %v131_v13 }
  0xd4   :  { %v505_v14 = vpop.f32.mrf.mxu0 }
  0xd5   :  { %385 = vmatprep.mubr.f32.mxu0 %v505_v14 }
  0xd6   :  { %v141_v15 = vpop.f32.mrf.mxu0 }
  0xd7   :  { %386 = vmatmul.mubr.f32.vlgmr.msra.gmra.mxu0 %v141_v15 }
  0xd8   :  { %v508_v16 = vpop.f32.mrf.mxu0 }
  0xd9   :  { %315 = vmatprep.mubr.f32.mxu1 %v508_v16 }
  0xda   :  { %v151_v17 = vpop.f32.mrf.mxu0 }
  0xdb   :  { %316 = vmatmul.mubr.f32.gmra.mxu1 %v151_v17 }
  0xdc   :  { %v511_v18 = vpop.f32.mrf.mxu0 }
  0xdd   :  { %390 = vmatprep.mubr.f32.mxu0 %v511_v18 }
  0xde   :  { %v161_v19 = vpop.f32.mrf.mxu0 }
  0xdf   :  { %391 = vmatmul.mubr.f32.gmra.mxu0 %v161_v19 }
 0x193   :  { %v454_v20 = vpop.f32.mrf.mxu1 }
 0x195   :  { %v455_v21 = vpop.f32.mrf.mxu1 }
 0x196   :  { %v456_v22 = vadd.f32 %v455_v21, %v454_v20 }
 0x197   :  { %v492_v24 = vpop.f32.mrf.mxu0 }
 0x198   :  { %v313_v26 = vadd.f32 %v456_v22, %v239_v23 }
 0x199   :  { %v493_v25 = vpop.f32.mrf.mxu0 }
 0x19a   :  { %v494_v27 = vadd.f32 %v493_v25, %v492_v24 }
 0x19b   :  { %v457_v28 = vpop.f32.mrf.mxu1 }
 0x19c   :  { %v388_v29 = vadd.f32 %v494_v27, %v313_v26 }
 0x19d   :  { %v458_v30 = vpop.f32.mrf.mxu1 }
 0x19e   :  { %v396_v31 = vmax.f32 %v388_v29, 0.0  ;;  %v459_v32 = vadd.f32 %v458_v30, %v457_v28 }
 0x19f   :  { %v495_v33 = vpop.f32.mrf.mxu0 }
 0x1a0   :  { %398 = vst [vmem:[%s622_s4] sm:$0xff] %v396_v31  ;;  %v318_v36 = vadd.f32 %v459_v32, %v244_v34 }
 0x1a1   :  { %v496_v35 = vpop.f32.mrf.mxu0 }
 0x1a2   :  { %v497_v37 = vadd.f32 %v496_v35, %v495_v33 }
 0x1a4   :  { %v393_v38 = vadd.f32 %v497_v37, %v318_v36 }
 0x1a6   :  { %v397_v39 = vmax.f32 %v393_v38, 0.0 }
 0x1a8   :  { %399 = vst [vmem:[%s622_s4 + $0x8] sm:$0xff] %v397_v39 }
 0x1a9   :  { %404 = vsyncpa [#allocation3], 1 }

</bundles_post_ra>
